<compile_context>
chip_gen: v5e
topology: v5e:2x2
jax: 0.10.0
libtpu: 0.0.40
codegen_flags: <defaults>
</compile_context>

<pallas_src>
import functools

import numpy as np
import jax
import jax.numpy as jnp
from jax import lax
from jax.experimental import pallas as pl
from jax.experimental.pallas import tpu as pltpu

N_BINS = 15
# i / n_bins with f32 division — identical to what the kernels rebuild via iota.
_BIN_BOUNDARIES = np.arange(N_BINS + 1, dtype=np.float32) / np.float32(N_BINS)

_VMEM_LIMIT_BYTES = 48 * 1024 * 1024  # per-core scoped VMEM request (fits v7x 64 MiB/TC)


def _round_up(x, m):
    return ((x + m - 1) // m) * m


def _pick_tile_small_c(n, c, max_tile_n=None):
    """Batch tile for the C < 128 (in-kernel transpose) path.

    The DMA'd (tile_n, C) block is lane-padded to 128 in VMEM (512*tile_n bytes per
    buffer regardless of C); per-class temporaries cost ~4*round_up(C,8)*tile_n bytes.
    Keep each a few MiB so 2x double-buffered inputs + temporaries stay well inside the
    per-core VMEM budget on every generation.
    """
    c_pad = _round_up(c, 8)
    t = (2 * 1024 * 1024) // (c_pad * 4)
    t = max(512, min(8192, (t // 128) * 128))   # multiple of 128 (labels lane axis)
    if max_tile_n is not None:
        t = min(t, max_tile_n)
    return n if n <= t else t


def _pick_tile_rows(n, c, max_tile_n=None):
    """Batch tile (sublane axis) for the row-major C >= 128 path (~4 MiB HBM per tile)."""
    c_pad = _round_up(c, 128)
    t = (4 * 1024 * 1024) // (c_pad * 4)
    t = max(8, min(2048, (t // 8) * 8))          # multiple of 8 (sublane axis)
    if max_tile_n is not None:
        t = min(t, max_tile_n)
    return n if n <= t else t


def _ece_bins_kernel_small_c(logits_ref, labels_ref, out_ref, *, n_total):
    """C < 128: DMA the row-major (tile_n, C) block, transpose it in VMEM so the batch
    sits on the 128-lane axis, then do softmax stats + one-hot binning lane-dense."""
    i = pl.program_id(0)
    x = logits_ref[...]                                   # (tile_n, C) f32
    tile_n, c = x.shape
    lt = jnp.transpose(x, (1, 0))                         # (C, tile_n) — XLU transpose
    labels = labels_ref[...]                              # (1, tile_n) i32

    # Softmax statistics over the class (sublane) axis; probs never materialized.
    m = jnp.max(lt, axis=0, keepdims=True)                # (1, tile_n)
    s = jnp.sum(jnp.exp(lt - m), axis=0, keepdims=True)   # (1, tile_n)
    conf = 1.0 / s                                        # max softmax prob (exact divide)

    cls = lax.broadcasted_iota(jnp.int32, lt.shape, 0)
    pred = jnp.min(jnp.where(lt == m, cls, c), axis=0, keepdims=True)   # first argmax
    acc = (pred == labels).astype(jnp.float32)            # (1, tile_n)

    # Mask the undefined tail of the last partial block BEFORE anything multiplies conf
    # (avoids 0 * NaN). conf == 0 falls outside every bin (bin 0 needs conf > 0).
    col = lax.broadcasted_iota(jnp.int32, (1, tile_n), 1) + i * tile_n
    valid = col < n_total
    conf = jnp.where(valid, conf, 0.0)
    acc = jnp.where(valid, acc, 0.0)

    # Bin boundaries rebuilt in-kernel (no captured array constants).
    b = lax.broadcasted_iota(jnp.int32, (N_BINS, 1), 0).astype(jnp.float32)
    lowers = b / float(N_BINS)
    uppers = (b + 1.0) / float(N_BINS)
    in_bin = jnp.logical_and(conf > lowers, conf <= uppers).astype(jnp.float32)  # (15,tile_n)

    cnt = jnp.sum(in_bin, axis=1, keepdims=True)           # (15, 1)
    csum = jnp.sum(in_bin * conf, axis=1, keepdims=True)   # (15, 1)
    asum = jnp.sum(in_bin * acc, axis=1, keepdims=True)    # (15, 1)

    # Single stacked store of the per-tile partials (no 3x masked partial stores).
    j = lax.broadcasted_iota(jnp.int32, (N_BINS, 3), 1)
    out_ref[...] = jnp.where(j == 0, cnt, jnp.where(j == 1, csum, asum))


def _ece_bins_kernel_rows(logits_ref, labels_ref, out_ref, *, n_total):
    """C >= 128: row-major (tile_n, C) block, classes already lane-dense."""
    i = pl.program_id(0)
    x = logits_ref[...]                                   # (tile_n, C) f32
    labels = labels_ref[...]                              # (tile_n, 1) i32
    tile_n, c = x.shape

    m = jnp.max(x, axis=1, keepdims=True)                 # (tile_n, 1)
    s = jnp.sum(jnp.exp(x - m), axis=1, keepdims=True)    # (tile_n, 1)
    conf = 1.0 / s

    cls = lax.broadcasted_iota(jnp.int32, x.shape, 1)
    pred = jnp.min(jnp.where(x == m, cls, c), axis=1, keepdims=True)
    acc = (pred == labels).astype(jnp.float32)            # (tile_n, 1)

    row = lax.broadcasted_iota(jnp.int32, (tile_n, 1), 0) + i * tile_n
    valid = row < n_total
    conf = jnp.where(valid, conf, 0.0)
    acc = jnp.where(valid, acc, 0.0)

    b = lax.broadcasted_iota(jnp.int32, (1, N_BINS), 1).astype(jnp.float32)
    lowers = b / float(N_BINS)
    uppers = (b + 1.0) / float(N_BINS)
    in_bin = jnp.logical_and(conf > lowers, conf <= uppers).astype(jnp.float32)  # (tile_n,15)

    cnt = jnp.sum(in_bin, axis=0, keepdims=True)            # (1, 15)
    csum = jnp.sum(in_bin * conf, axis=0, keepdims=True)    # (1, 15)
    asum = jnp.sum(in_bin * acc, axis=0, keepdims=True)     # (1, 15)

    j = lax.broadcasted_iota(jnp.int32, (3, N_BINS), 0)
    out_ref[...] = jnp.where(j == 0, cnt, jnp.where(j == 1, csum, asum))


def conf_ece_loss(logits, labels, *, max_tile_n=None):
    """logits: (N, C) float, labels: (N,) int — returns shape (1,) float32 ECE.

    max_tile_n (optional, testing): cap the batch tile. For the C<128 path it must be a
    multiple of 128; for the C>=128 path a multiple of 8.
    """
    n, c = logits.shape
    logits = logits.astype(jnp.float32)
    labels = labels.astype(jnp.int32)

    cost = pl.CostEstimate(flops=int(6 * n * c), transcendentals=int(n * c),
                           bytes_accessed=int(4 * n * c + 4 * n + 12 * N_BINS))
    cparams = pltpu.CompilerParams(dimension_semantics=("parallel",),
                                   vmem_limit_bytes=_VMEM_LIMIT_BYTES)

    if c < 128:
        tile_n = _pick_tile_small_c(n, c, max_tile_n)
        num_tiles = -(-n // tile_n)
        labels2d = labels.reshape(1, n)                    # metadata-only reshape
        partials = pl.pallas_call(
            functools.partial(_ece_bins_kernel_small_c, n_total=n),
            out_shape=jax.ShapeDtypeStruct((num_tiles, N_BINS, 3), jnp.float32),
            grid_spec=pltpu.PrefetchScalarGridSpec(
                num_scalar_prefetch=0,
                grid=(num_tiles,),
                in_specs=[pl.BlockSpec((tile_n, c), lambda i: (i, 0)),
                          pl.BlockSpec((1, tile_n), lambda i: (0, i))],
                out_specs=pl.BlockSpec((None, N_BINS, 3), lambda i: (i, 0, 0)),
            ),
            compiler_params=cparams,
            cost_estimate=cost,
        )(logits, labels2d)
        bins = jnp.sum(partials, axis=0)                   # (N_BINS, 3) global sums
        counts, conf_sum, acc_sum = bins[:, 0], bins[:, 1], bins[:, 2]
    else:
        tile_n = _pick_tile_rows(n, c, max_tile_n)
        num_tiles = -(-n // tile_n)
        labels2d = labels.reshape(n, 1)                    # metadata-only reshape
        partials = pl.pallas_call(
            functools.partial(_ece_bins_kernel_rows, n_total=n),
            out_shape=jax.ShapeDtypeStruct((num_tiles, 3, N_BINS), jnp.float32),
            grid_spec=pltpu.PrefetchScalarGridSpec(
                num_scalar_prefetch=0,
                grid=(num_tiles,),
                in_specs=[pl.BlockSpec((tile_n, c), lambda i: (i, 0)),
                          pl.BlockSpec((tile_n, 1), lambda i: (i, 0))],
                out_specs=pl.BlockSpec((None, 3, N_BINS), lambda i: (i, 0, 0)),
            ),
            compiler_params=cparams,
            cost_estimate=cost,
        )(logits, labels2d)
        bins = jnp.sum(partials, axis=0)                   # (3, N_BINS) global sums
        counts, conf_sum, acc_sum = bins[0], bins[1], bins[2]

    # Tiny 15-element finalize on GLOBAL accumulations (matches torch semantics,
    # including the `if prop_in_bin > 0` guard).
    prop = counts / jnp.float32(n)
    safe = jnp.maximum(counts, 1.0)
    term = jnp.abs(conf_sum / safe - acc_sum / safe) * prop
    ece = jnp.sum(jnp.where(counts > 0.0, term, 0.0))
    return ece.reshape(1)


def _ece_reference(logits, labels):
    """Pure-JAX reference mirroring torch ConfECELoss semantics."""
    probs = jax.nn.softmax(logits, axis=1)
    conf = jnp.max(probs, axis=1)
    pred = jnp.argmax(probs, axis=1)
    acc = (pred == labels).astype(jnp.float32)
    n = logits.shape[0]
    ece = jnp.zeros((), jnp.float32)
    for b in range(N_BINS):
        lo, hi = float(_BIN_BOUNDARIES[b]), float(_BIN_BOUNDARIES[b + 1])
        in_bin = jnp.logical_and(conf > lo, conf <= hi)
        count = jnp.sum(in_bin.astype(jnp.float32))
        prop = count / n
        sc = jnp.maximum(count, 1.0)
        conf_mean = jnp.sum(jnp.where(in_bin, conf, 0.0)) / sc
        acc_mean = jnp.sum(jnp.where(in_bin, acc, 0.0)) / sc
        ece = ece + jnp.where(count > 0.0, jnp.abs(conf_mean - acc_mean) * prop, 0.0)
    return ece.reshape(1)


if __name__ == "__main__":
    key = jax.random.PRNGKey(0)
    k1, k2, k3, k4, k5, k6, k7, k8 = jax.random.split(key, 8)

    # Case 1: small class count (C < 128) — in-kernel-transpose path, single tile.
    N1, C1 = 16, 8
    logits1 = jax.random.normal(k1, (N1, C1), dtype=jnp.float32) * 2.0
    labels1 = jax.random.randint(k2, (N1,), 0, C1, dtype=jnp.int32)
    ece1 = conf_ece_loss(logits1, labels1)
    jax.block_until_ready(ece1)
    ref1 = _ece_reference(logits1, labels1)
    assert ece1.shape == (1,)
    assert np.allclose(np.asarray(ece1), np.asarray(ref1), atol=1e-5), (ece1, ref1)

    # Case 2: larger class count (C >= 128) — row-major path, single tile.
    N2, C2 = 60, 256
    logits2 = jax.random.normal(k3, (N2, C2), dtype=jnp.float32) * 2.0
    labels2 = jax.random.randint(k4, (N2,), 0, C2, dtype=jnp.int32)
    ece2 = conf_ece_loss(logits2, labels2)
    jax.block_until_ready(ece2)
    ref2 = _ece_reference(logits2, labels2)
    assert np.allclose(np.asarray(ece2), np.asarray(ref2), atol=1e-5), (ece2, ref2)

    # Case 3: C < 128 with multiple tiles and a partial (masked) tail block.
    N3, C3 = 200, 8
    logits3 = jax.random.normal(k5, (N3, C3), dtype=jnp.float32) * 2.0
    labels3 = jax.random.randint(k6, (N3,), 0, C3, dtype=jnp.int32)
    ece3 = conf_ece_loss(logits3, labels3, max_tile_n=128)
    jax.block_until_ready(ece3)
    ref3 = _ece_reference(logits3, labels3)
    assert np.allclose(np.asarray(ece3), np.asarray(ref3), atol=1e-5), (ece3, ref3)

    # Case 4: C >= 128 with multiple tiles and a partial (masked) tail block.
    N4, C4 = 44, 256
    logits4 = jax.random.normal(k7, (N4, C4), dtype=jnp.float32) * 2.0
    labels4 = jax.random.randint(k8, (N4,), 0, C4, dtype=jnp.int32)
    ece4 = conf_ece_loss(logits4, labels4, max_tile_n=16)
    jax.block_until_ready(ece4)
    ref4 = _ece_reference(logits4, labels4)
    assert np.allclose(np.asarray(ece4), np.asarray(ref4), atol=1e-5), (ece4, ref4)

    print("KERNEL_OK")
</pallas_src>

<mosaic_0001>
module attributes {stable_mosaic.version = 11 : i64} {
  func.func @_ece_bins_kernel_small_c(%arg0: i32, %arg1: memref<16x8xf32, #tpu.memory_space<vmem>>, %arg2: memref<1x16xi32, #tpu.memory_space<vmem>>, %arg3: memref<1x15x3xf32, #tpu.memory_space<vmem>>) attributes {dimension_semantics = [#tpu.dimension_semantics<parallel>], iteration_bounds = array<i64: 1>, scalar_prefetch = 0 : i64, scratch_operands = 0 : i64, tpu.core_type = #tpu.core_type<tc>, window_params = [{transform_indices = @transform_0, window_bounds = array<i64: 16, 8>}, {transform_indices = @transform_1, window_bounds = array<i64: 1, 16>}, {transform_indices = @transform_2, window_bounds = array<i64: 1, 15, 3>}]} {
    %c0 = arith.constant 0 : index
    %c0_0 = arith.constant 0 : index
    %0 = vector.load %arg1[%c0, %c0_0] : memref<16x8xf32, #tpu.memory_space<vmem>>, vector<16x8xf32>
    %1 = tpu.transpose %0, [1, 0] : vector<16x8xf32> -> vector<8x16xf32>
    %c0_1 = arith.constant 0 : index
    %c0_2 = arith.constant 0 : index
    %2 = vector.load %arg2[%c0_1, %c0_2] : memref<1x16xi32, #tpu.memory_space<vmem>>, vector<1x16xi32>
    %cst = arith.constant dense<0xFF800000> : vector<16xf32>
    %3 = vector.multi_reduction <maximumf>, %1, %cst [0] : vector<8x16xf32> to vector<16xf32>
    %4 = vector.shape_cast %3 : vector<16xf32> to vector<1x16xf32>
    %5 = vector.broadcast %4 : vector<1x16xf32> to vector<8x16xf32>
    %6 = arith.subf %1, %5 : vector<8x16xf32>
    %7 = math.exp %6 : vector<8x16xf32>
    %cst_3 = arith.constant dense<0.000000e+00> : vector<16xf32>
    %8 = vector.multi_reduction <add>, %7, %cst_3 [0] : vector<8x16xf32> to vector<16xf32>
    %9 = vector.shape_cast %8 : vector<16xf32> to vector<1x16xf32>
    %cst_4 = arith.constant 1.000000e+00 : f32
    %10 = vector.broadcast %cst_4 : f32 to vector<1x16xf32>
    %11 = arith.divf %10, %9 : vector<1x16xf32>
    %12 = tpu.iota {dimensions = array<i32: 0>} : vector<8x16xi32>
    %13 = vector.broadcast %4 : vector<1x16xf32> to vector<8x16xf32>
    %14 = arith.cmpf oeq, %1, %13 : vector<8x16xf32>
    %c8_i32 = arith.constant 8 : i32
    %15 = vector.broadcast %c8_i32 : i32 to vector<8x16xi32>
    %16 = arith.select %14, %12, %15 : vector<8x16xi1>, vector<8x16xi32>
    %cst_5 = arith.constant dense<2147483647> : vector<16xi32>
    %17 = vector.multi_reduction <minsi>, %16, %cst_5 [0] : vector<8x16xi32> to vector<16xi32>
    %18 = vector.shape_cast %17 : vector<16xi32> to vector<1x16xi32>
    %19 = arith.cmpi eq, %18, %2 : vector<1x16xi32>
    %20 = arith.extui %19 : vector<1x16xi1> to vector<1x16xi32>
    %21 = arith.sitofp %20 : vector<1x16xi32> to vector<1x16xf32>
    %22 = tpu.iota {dimensions = array<i32: 1>} : vector<1x16xi32>
    %c16_i32 = arith.constant 16 : i32
    %23 = arith.muli %arg0, %c16_i32 : i32
    %24 = vector.broadcast %23 : i32 to vector<1x16xi32>
    %25 = arith.addi %22, %24 : vector<1x16xi32>
    %c16_i32_6 = arith.constant 16 : i32
    %26 = vector.broadcast %c16_i32_6 : i32 to vector<1x16xi32>
    %27 = arith.cmpi slt, %25, %26 : vector<1x16xi32>
    %cst_7 = arith.constant 0.000000e+00 : f32
    %28 = vector.broadcast %cst_7 : f32 to vector<1x16xf32>
    %29 = arith.select %27, %11, %28 : vector<1x16xi1>, vector<1x16xf32>
    %cst_8 = arith.constant 0.000000e+00 : f32
    %30 = vector.broadcast %cst_8 : f32 to vector<1x16xf32>
    %31 = arith.select %27, %21, %30 : vector<1x16xi1>, vector<1x16xf32>
    %32 = tpu.iota {dimensions = array<i32: 0>} : vector<15x1xi32>
    %33 = arith.sitofp %32 : vector<15x1xi32> to vector<15x1xf32>
    %cst_9 = arith.constant 1.500000e+01 : f32
    %34 = vector.broadcast %cst_9 : f32 to vector<15x1xf32>
    %35 = arith.divf %33, %34 : vector<15x1xf32>
    %cst_10 = arith.constant 1.000000e+00 : f32
    %36 = vector.broadcast %cst_10 : f32 to vector<15x1xf32>
    %37 = arith.addf %33, %36 : vector<15x1xf32>
    %cst_11 = arith.constant 1.500000e+01 : f32
    %38 = vector.broadcast %cst_11 : f32 to vector<15x1xf32>
    %39 = arith.divf %37, %38 : vector<15x1xf32>
    %40 = vector.broadcast %29 : vector<1x16xf32> to vector<15x16xf32>
    %41 = vector.broadcast %35 : vector<15x1xf32> to vector<15x16xf32>
    %42 = arith.cmpf ogt, %40, %41 : vector<15x16xf32>
    %43 = vector.broadcast %29 : vector<1x16xf32> to vector<15x16xf32>
    %44 = vector.broadcast %39 : vector<15x1xf32> to vector<15x16xf32>
    %45 = arith.cmpf ole, %43, %44 : vector<15x16xf32>
    %46 = arith.andi %42, %45 : vector<15x16xi1>
    %47 = arith.extui %46 : vector<15x16xi1> to vector<15x16xi32>
    %48 = arith.sitofp %47 : vector<15x16xi32> to vector<15x16xf32>
    %cst_12 = arith.constant dense<0.000000e+00> : vector<15xf32>
    %49 = vector.multi_reduction <add>, %48, %cst_12 [1] : vector<15x16xf32> to vector<15xf32>
    %50 = vector.shape_cast %49 : vector<15xf32> to vector<15x1xf32>
    %51 = vector.broadcast %29 : vector<1x16xf32> to vector<15x16xf32>
    %52 = arith.mulf %48, %51 : vector<15x16xf32>
    %cst_13 = arith.constant dense<0.000000e+00> : vector<15xf32>
    %53 = vector.multi_reduction <add>, %52, %cst_13 [1] : vector<15x16xf32> to vector<15xf32>
    %54 = vector.shape_cast %53 : vector<15xf32> to vector<15x1xf32>
    %55 = vector.broadcast %31 : vector<1x16xf32> to vector<15x16xf32>
    %56 = arith.mulf %48, %55 : vector<15x16xf32>
    %cst_14 = arith.constant dense<0.000000e+00> : vector<15xf32>
    %57 = vector.multi_reduction <add>, %56, %cst_14 [1] : vector<15x16xf32> to vector<15xf32>
    %58 = vector.shape_cast %57 : vector<15xf32> to vector<15x1xf32>
    %59 = tpu.iota {dimensions = array<i32: 1>} : vector<15x3xi32>
    %c0_i32 = arith.constant 0 : i32
    %60 = vector.broadcast %c0_i32 : i32 to vector<15x3xi32>
    %61 = arith.cmpi eq, %59, %60 : vector<15x3xi32>
    %c1_i32 = arith.constant 1 : i32
    %62 = vector.broadcast %c1_i32 : i32 to vector<15x3xi32>
    %63 = arith.cmpi eq, %59, %62 : vector<15x3xi32>
    %64 = vector.shape_cast %54 : vector<15x1xf32> to vector<15x1xf32>
    %65 = vector.broadcast %64 : vector<15x1xf32> to vector<15x3xf32>
    %66 = vector.shape_cast %58 : vector<15x1xf32> to vector<15x1xf32>
    %67 = vector.broadcast %66 : vector<15x1xf32> to vector<15x3xf32>
    %68 = arith.select %63, %65, %67 : vector<15x3xi1>, vector<15x3xf32>
    %69 = vector.shape_cast %50 : vector<15x1xf32> to vector<15x1xf32>
    %70 = vector.broadcast %69 : vector<15x1xf32> to vector<15x3xf32>
    %71 = arith.select %61, %70, %68 : vector<15x3xi1>, vector<15x3xf32>
    %c0_15 = arith.constant 0 : index
    %c0_16 = arith.constant 0 : index
    %c0_17 = arith.constant 0 : index
    %72 = vector.load %arg3[%c0_15, %c0_16, %c0_17] : memref<1x15x3xf32, #tpu.memory_space<vmem>>, vector<1x15x3xf32>
    %73 = vector.shape_cast %72 : vector<1x15x3xf32> to vector<15x3xf32>
    %74 = vector.shape_cast %71 : vector<15x3xf32> to vector<1x15x3xf32>
    tpu.vector_store %arg3[%c0_15, %c0_16, %c0_17], %74 {strides = array<i32>} : memref<1x15x3xf32, #tpu.memory_space<vmem>>, vector<1x15x3xf32>,
    return
  }
  func.func @transform_0(%arg0: i32) -> (i32, i32) {
    %c0_i32 = arith.constant 0 : i32
    %c0_i32_0 = arith.constant 0 : i32
    return %arg0, %c0_i32 : i32, i32
  }
  func.func @transform_1(%arg0: i32) -> (i32, i32) {
    %c0_i32 = arith.constant 0 : i32
    %c0_i32_0 = arith.constant 0 : i32
    return %c0_i32, %arg0 : i32, i32
  }
  func.func @transform_2(%arg0: i32) -> (i32, i32, i32) {
    %c0_i32 = arith.constant 0 : i32
    %c0_i32_0 = arith.constant 0 : i32
    %c0_i32_1 = arith.constant 0 : i32
    return %arg0, %c0_i32, %c0_i32_0 : i32, i32, i32
  }
}

</mosaic_0001>

<bundles_post_ra>
// kernel: tpu_custom_call.1
= control target key start
LH: loop header
LB: loop body
LE: loop exit
PB: predicated region body
PF: predicated region fallthrough
CT: control target
= control target key end

     0   :  { %vm46_vm0 = vcmask 130048   ;;  %v79_v7 = vlaneseq  ;;  %v179_v17 = vmov 15.0   ;;  %v180_v54 = vmov 0.0   ;;  %s222_s0 = inlined_call_operand.vmem [shape: f32[16,8], index: 0, kind: input, shape index: {}]   ;;  %s223_s1 = inlined_call_operand.vmem [shape: s32[1,16], index: 1, kind: input, shape index: {}]   ;;  %s224_s2 = inlined_call_operand.vmem [shape: f32[1,15,3], index: 2, kind: output, shape index: {}]  }
   0x1   :  { %v11_v0 = vld [vmem:[%s222_s0] sm:$0xff]  ;;  %v12_v1 = vld [vmem:[%s222_s0 + $0x8] sm:$0xff] }
   0x2   :  { %13 = vxpose.xlu0.b32.start [1/2] (short) (narrow) %v11_v0, 8  ;;  %v80_v10 = vshrl.u32 %v79_v7, 7  ;;  %v205_v40 = vand.u32 127, %v79_v7  ;;  %v45_v41 = vld [vmem:[%s223_s1] sm:$0x1] }
   0x4   :  { %v104_v34 = vadd.s32 8, %v80_v10  ;;  %v105_v35 = vcvt.s32.f32 %v80_v10  ;;  %vm101_vm8 = vcmp.lt.s32.totalorder %v205_v40, 16 }
   0x6   :  { %v106_v38 = vcvt.s32.f32 %v104_v34  ;;  %v116_v44 = vadd.f32 1.0, %v105_v35 }
   0x8   :  { %v117_v47 = vadd.f32 1.0, %v106_v38 }
   0xa   :  { %14 = vxpose.xlu0.b32.end [2/2] (short) (narrow) %v12_v1, 8 }
  0xa6   :  { %v29_v2 = vpop.trf.xlu0 }
  0xa7   :  { %v47_v3 = vsel %vm46_vm0, %v29_v2, -inf }
  0xa8   :  { %v48_v4 = vrot.slane %v47_v3, 4 }
  0xaa   :  { %v49_v5 = vmax.f32 %v47_v3, %v48_v4 }
  0xac   :  { %v50_v6 = vrot.slane %v49_v5, 2 }
  0xae   :  { %v51_v8 = vmax.f32 %v49_v5, %v50_v6 }
  0xb0   :  { %v52_v9 = vrot.slane %v51_v8, 1 }
  0xb2   :  { %v53_v11 = vmax.f32 %v51_v8, %v52_v9 }
  0xb4   :  { %v54_v12 = vsub.f32 %v29_v2, %v53_v11  ;;  %vm81_vm1 = vcmp.eq.f32.partialorder %v29_v2, %v53_v11 }
  0xb5   :  { %v82_v13 = vsel %vm81_vm1, %v80_v10, 8 }
  0xb6   :  { %v55_v14 = vmul.f32 1.442695, %v54_v12  ;;  %v83_v15 = vsel %vm46_vm0, %v82_v13, 2147483647 }
  0xb7   :  { %v84_v16 = vrot.slane %v83_v15, 4 }
  0xb8   :  { %173 = vpow2.f32 %v55_v14 }
  0xb9   :  { %vm85_vm2 = vcmp.lt.s32.totalorder %v83_v15, %v84_v16  ;;  %175 = vrcp.f32 %v179_v17 }
  0xba   :  { %v86_v21 = vsel %vm85_vm2, %v83_v15, %v84_v16 }
  0xbb   :  { %v87_v24 = vrot.slane %v86_v21, 2 }
  0xbd   :  { %vm88_vm3 = vcmp.lt.s32.totalorder %v86_v21, %v87_v24 }
  0xbe   :  { %v174_v18 = vpop.eup %173  ;;  %v89_v31 = vsel %vm88_vm3, %v86_v21, %v87_v24  ;;  %vm133_vm3 = vcmask 129024  }
  0xbf   :  { %v57_v19 = vsel %vm46_vm0, %v174_v18, 0.0  ;;  %v176_v23 = vpop.eup %175  ;;  %v90_v32 = vrot.slane %v89_v31, 1 }
  0xc0   :  { %v58_v20 = vrot.slane %v57_v19, 4  ;;  %v108_v27 = vmul.f32 15.0, %v176_v23  ;;  %vm112_vm5 = vweird.f32 %v176_v23 }
  0xc1   :  { %vm91_vm4 = vcmp.lt.s32.totalorder %v89_v31, %v90_v32 }
  0xc2   :  { %v59_v22 = vadd.f32 %v58_v20, %v57_v19  ;;  %v109_v30 = vsub.f32 1.0, %v108_v27  ;;  %v92_v42 = vsel %vm91_vm4, %v89_v31, %v90_v32  ;;  %vm154_vm4 = vcmp.eq.s32.totalorder %v205_v40, 0 }
  0xc3   :  { %vm93_vm7 = vcmp.eq.s32.totalorder %v92_v42, %v45_v41 }
  0xc4   :  { %v60_v25 = vrot.slane %v59_v22, 2  ;;  %v110_v33 = vmul.f32 %v176_v23, %v109_v30  ;;  %v168_v55 = vsel %vm93_vm7, 1.0, %v180_v54 }
  0xc5   :  { %v103_v61 = vsel %vm101_vm8, %v168_v55, 0.0 }
  0xc6   :  { %v61_v26 = vadd.f32 %v60_v25, %v59_v22  ;;  %v111_v37 = vadd.f32 %v176_v23, %v110_v33  ;;  %v145_v63 = vperm.slane %v103_v61, 0 }
  0xc8   :  { %v62_v28 = vrot.slane %v61_v26, 1  ;;  %v113_v46 = vsel %vm112_vm5, %v176_v23, %v111_v37  ;;  %vm155_vm5 = vcmp.eq.s32.totalorder %v205_v40, 1 }
  0xc9   :  { %v114_v51 = vmul.f32 %v113_v46, %v105_v35  ;;  %v118_v52 = vmul.f32 %v116_v44, %v113_v46  ;;  %v115_v56 = vmul.f32 %v113_v46, %v106_v38  ;;  %v119_v57 = vmul.f32 %v117_v47, %v113_v46 }
  0xca   :  { %v63_v29 = vadd.f32 %v62_v28, %v61_v26 }
  0xcc   :  { %177 = vrcp.f32 %v63_v29  ;;  %v75_v45 = vand.u32 2147483648, %v63_v29  ;;  %v73_v49 = vand.u32 2147483647, %v63_v29  ;;  %vm69_vm9 = vweird.f32 %v63_v29 }
  0xce   :  { %v76_v53 = vor.u32 1.1754944e-38, %v75_v45  ;;  %vm74_vm11 = vcmp.eq.f32.partialorder %v73_v49, 8.507059e+37 }
  0xd2   :  { %v178_v36 = vpop.eup %177 }
  0xd3   :  { %v65_v39 = vmul.f32 %v178_v36, %v63_v29  ;;  %vm70_vm6 = vweird.f32 %v178_v36 }
  0xd4   :  { %vm71_vm10 = vmor %vm69_vm9, %vm70_vm6  ;;  %vm160_vm6 = vcmask 23552  }
  0xd5   :  { %v66_v43 = vsub.f32 1.0, %v65_v39 }
  0xd7   :  { %v67_v48 = vmul.f32 %v178_v36, %v66_v43 }
  0xd9   :  { %v68_v50 = vadd.f32 %v178_v36, %v67_v48 }
  0xdb   :  { %v72_v58 = vsel %vm71_vm10, %v178_v36, %v68_v50 }
  0xdc   :  { %v77_v59 = vsel %vm74_vm11, %v76_v53, %v72_v58 }
  0xdd   :  { %v102_v60 = vsel %vm101_vm8, %v77_v59, 0.0 }
  0xde   :  { %vm120_vm12 = vcmp.gt.f32.partialorder %v102_v60, %v114_v51  ;;  %vm122_vm13 = vcmp.le.f32.partialorder %v102_v60, %v118_v52  ;;  %vm121_vm14 = vcmp.gt.f32.partialorder %v102_v60, %v115_v56  ;;  %vm123_vm15 = vcmp.le.f32.partialorder %v102_v60, %v119_v57 }
  0xdf   :  { %vm124_vm1 = vmand %vm120_vm12, %vm122_vm13 }
  0xe0   :  { %v169_v62 = vsel %vm124_vm1, 1.0, %v180_v54  ;;  %vm125_vm2 = vmand %vm121_vm14, %vm123_vm15 }
  0xe1   :  { %v130_v0 = vsel %vm46_vm0, %v169_v62, 0.0  ;;  %v170_v1 = vsel %vm125_vm2, 1.0, %v180_v54  ;;  %v137_v6 = vmul.f32 %v169_v62, %v102_v60  ;;  %v146_v7 = vmul.f32 %v169_v62, %v145_v63 }
  0xe2   :  { %131 = vadd.xlane.f32.xlu1 %v130_v0  ;;  %v147_v2 = vmul.f32 %v170_v1, %v145_v63  ;;  %v138_v3 = vmul.f32 %v170_v1, %v102_v60  ;;  %v134_v10 = vsel %vm133_vm3, %v170_v1, 0.0 }
  0xe3   :  { %v139_v8 = vsel %vm46_vm0, %v137_v6, 0.0  ;;  %v148_v9 = vsel %vm46_vm0, %v146_v7, 0.0  ;;  %vm162_vm0 = vcmask 22528  }
  0xe4   :  { %v151_v4 = vsel %vm133_vm3, %v147_v2, 0.0  ;;  %v142_v5 = vsel %vm133_vm3, %v138_v3, 0.0 }
  0xe5   :  { %152 = vadd.xlane.f32.xlu0 %v151_v4  ;;  %143 = vadd.xlane.f32.xlu2 %v142_v5 }
  0xea   :  { %140 = vadd.xlane.f32.xlu1 %v139_v8 }
  0xed   :  { %149 = vadd.xlane.f32.xlu2 %v148_v9 }
  0xf2   :  { %135 = vadd.xlane.f32.xlu1 %v134_v10 }
 0x155   :  { %v132_v11 = vpop.xlane.xlu1 %131 }
 0x158   :  { %v144_v12 = vpop.xlane.xlu2 %143  ;;  %v153_v16 = vpop.xlane.xlu0 %152 }
 0x159   :  { %v157_v18 = vsel %vm155_vm5, %v144_v12, %v153_v16 }
 0x15d   :  { %v141_v13 = vpop.xlane.xlu1 %140 }
 0x160   :  { %v150_v14 = vpop.xlane.xlu2 %149 }
 0x161   :  { %v156_v15 = vsel %vm155_vm5, %v141_v13, %v150_v14 }
 0x162   :  { %v158_v17 = vsel %vm154_vm4, %v132_v11, %v156_v15 }
 0x163   :  { %161 = vst.msk [vmem:[%s224_s2] sm:$0xff] %vm160_vm6, %v158_v17 }
 0x165   :  { %v136_v19 = vpop.xlane.xlu1 %135 }
 0x166   :  { %v159_v20 = vsel %vm154_vm4, %v136_v19, %v157_v18 }
 0x167   :  { %163 = vst.msk [vmem:[%s224_s2 + $0x8] sm:$0x7f] %vm162_vm0, %v159_v20 }

</bundles_post_ra>
